<compile_context>
chip_gen: v5e
topology: v5e:2x2
jax: 0.10.0
libtpu: 0.0.40
codegen_flags: <defaults>
</compile_context>

<pallas_src>
import jax
import jax.numpy as jnp
from jax.experimental import pallas as pl
from jax.experimental.pallas import tpu as pltpu

HIDDEN_PAD = 128  # hidden width padded to one full lane register (VMEM-only)


def _round_up(x, m):
    return ((x + m - 1) // m) * m


def _pad2(a, rows, cols):
    return jnp.pad(a, ((0, rows - a.shape[0]), (0, cols - a.shape[1])))


def dqn_kernel(x_ref, w1_ref, b1_ref, w2_ref, b2_ref, w3_ref, b3_ref, out_ref):
    # fc1 + relu: (TB, S) @ (S, 128) -> (TB, 128); (1,128) bias broadcasts on VPU.
    h1 = jnp.dot(x_ref[...], w1_ref[...],
                 preferred_element_type=jnp.float32) + b1_ref[...]
    h1 = jnp.maximum(h1, 0.0)
    # fc2 + relu: (TB, 128) @ (128, 128) -> (TB, 128)
    h2 = jnp.dot(h1, w2_ref[...],
                 preferred_element_type=jnp.float32) + b2_ref[...]
    h2 = jnp.maximum(h2, 0.0)
    # fc3 (no activation): (TB, 128) @ (128, A_pad) -> (TB, A_pad)
    out = jnp.dot(h2, w3_ref[...],
                  preferred_element_type=jnp.float32) + b3_ref[...]
    out_ref[...] = out.astype(out_ref.dtype)


def prepare_params(params, state_size, action_size):
    """Pad weights/biases ONCE (hoisted out of the per-call hot path).

    Hidden dims are padded to 128 lanes, the input dim is left at state_size,
    and the output dim is padded to a multiple of 8 lanes.  Zero padding keeps
    the math exact (padded lanes carry exact zeros through ReLU and fc3).
    Weights are stored transposed [in, out], biases [1, out]
    (PyTorch `x @ weight.T + bias` semantics).
    """
    H = HIDDEN_PAD
    a_pad = max(8, _round_up(action_size, 8))
    w1, b1 = params["fc1"]
    w2, b2 = params["fc2"]
    w3, b3 = params["fc3"]
    return {
        "w1": _pad2(w1, state_size, H), "b1": _pad2(b1, 1, H),
        "w2": _pad2(w2, H, H),          "b2": _pad2(b2, 1, H),
        "w3": _pad2(w3, H, a_pad),      "b3": _pad2(b3, 1, a_pad),
        "state_size": state_size,
        "action_size": action_size,
        "action_pad": a_pad,
    }


def _choose_batch_tile(batch, min_steps=2, max_tile=8192):
    """Pick the batch tile: large (amortizes ~0.35us/step grid overhead) but
    split into >= min_steps parallel steps so both v7x TensorCores get work."""
    b8 = _round_up(batch, 8)
    if b8 <= 8 * min_steps:
        return b8                      # tiny batch: single step, no over-pad
    tb = _round_up(pl.cdiv(batch, min_steps), 8)
    return min(tb, max_tile)


def dqn_forward(state, padded):
    """state: [B, state_size] float32.  padded: output of prepare_params."""
    B, S = state.shape
    assert S == padded["state_size"]
    H = HIDDEN_PAD
    a_pad = padded["action_pad"]
    action_size = padded["action_size"]

    TB = _choose_batch_tile(B)
    Bp = _round_up(B, TB)
    nb = Bp // TB

    x_p = state.astype(jnp.float32)
    if Bp != B:
        x_p = jnp.pad(x_p, ((0, Bp - B), (0, 0)))   # rows only; feature dim untouched

    # Cost hint with the real (narrowed) shapes.
    flops = 2 * Bp * (S * H + H * H + H * a_pad)
    bytes_accessed = 4 * (Bp * S + Bp * a_pad
                          + S * H + H * H + H * a_pad + 2 * H + a_pad)
    cost = pl.CostEstimate(flops=flops, transcendentals=0,
                           bytes_accessed=bytes_accessed)

    resident = lambda i: (0, 0)
    single = pl.Buffered(1)            # constant index_map -> no double buffer
    x_spec = pl.BlockSpec((TB, S), lambda i: (i, 0))           # streamed
    out_spec = pl.BlockSpec((TB, a_pad), lambda i: (i, 0))     # streamed
    w1_spec = pl.BlockSpec((S, H), resident, pipeline_mode=single)
    w2_spec = pl.BlockSpec((H, H), resident, pipeline_mode=single)
    w3_spec = pl.BlockSpec((H, a_pad), resident, pipeline_mode=single)
    b1_spec = pl.BlockSpec((1, H), resident, pipeline_mode=single)
    b2_spec = pl.BlockSpec((1, H), resident, pipeline_mode=single)
    b3_spec = pl.BlockSpec((1, a_pad), resident, pipeline_mode=single)

    out_p = pl.pallas_call(
        dqn_kernel,
        out_shape=jax.ShapeDtypeStruct((Bp, a_pad), jnp.float32),
        grid_spec=pl.GridSpec(
            grid=(nb,),
            in_specs=[x_spec,
                      w1_spec, b1_spec,
                      w2_spec, b2_spec,
                      w3_spec, b3_spec],
            out_specs=out_spec,
        ),
        compiler_params=pltpu.CompilerParams(
            dimension_semantics=("parallel",),
        ),
        cost_estimate=cost,
    )(x_p, padded["w1"], padded["b1"], padded["w2"], padded["b2"],
      padded["w3"], padded["b3"])

    # slice the real batch rows / action columns back out
    return out_p[:B, :action_size]


def init_linear(key, in_features, out_features):
    """Deterministic init mimicking PyTorch nn.Linear default:
    U(-1/sqrt(in), 1/sqrt(in)) for both weight and bias."""
    kw, kb = jax.random.split(key)
    bound = 1.0 / jnp.sqrt(jnp.float32(in_features))
    # PyTorch weight is [out, in]; store transposed [in, out] for the kernel.
    w_t = jax.random.uniform(
        kw, (in_features, out_features), jnp.float32, -bound, bound
    )
    b = jax.random.uniform(kb, (1, out_features), jnp.float32, -bound, bound)
    return w_t, b


if __name__ == "__main__":
    state_size = 8
    action_size = 4
    batch = 2

    root = jax.random.PRNGKey(0)
    k_in, k1, k2, k3 = jax.random.split(root, 4)

    params = {
        "fc1": init_linear(k1, state_size, 24),
        "fc2": init_linear(k2, 24, 24),
        "fc3": init_linear(k3, 24, action_size),
    }
    state = jax.random.normal(k_in, (batch, state_size), jnp.float32)

    # Pad the parameters once (hot path is just the pallas_call).
    padded = prepare_params(params, state_size, action_size)

    out = dqn_forward(state, padded)
    out = jax.block_until_ready(out)

    # Pure-JAX reference check of the same math.
    def ref(x, p):
        h = jnp.maximum(x @ p["fc1"][0] + p["fc1"][1], 0.0)
        h = jnp.maximum(h @ p["fc2"][0] + p["fc2"][1], 0.0)
        return h @ p["fc3"][0] + p["fc3"][1]

    expected = ref(state, params)
    assert out.shape == (batch, action_size)
    assert jnp.allclose(out, expected, atol=2e-5, rtol=1e-5)
    print("KERNEL_OK")
</pallas_src>

<mosaic_0001>
module attributes {stable_mosaic.version = 11 : i64} {
  func.func @dqn_kernel(%arg0: i32, %arg1: memref<8x8xf32, #tpu.memory_space<vmem>>, %arg2: memref<8x128xf32, #tpu.memory_space<vmem>>, %arg3: memref<1x128xf32, #tpu.memory_space<vmem>>, %arg4: memref<128x128xf32, #tpu.memory_space<vmem>>, %arg5: memref<1x128xf32, #tpu.memory_space<vmem>>, %arg6: memref<128x8xf32, #tpu.memory_space<vmem>>, %arg7: memref<1x8xf32, #tpu.memory_space<vmem>>, %arg8: memref<8x8xf32, #tpu.memory_space<vmem>>) attributes {dimension_semantics = [#tpu.dimension_semantics<parallel>], iteration_bounds = array<i64: 1>, scalar_prefetch = 0 : i64, scratch_operands = 0 : i64, tpu.core_type = #tpu.core_type<tc>, window_params = [{transform_indices = @transform_0, window_bounds = array<i64: 8, 8>}, {pipeline_mode = #tpu.pipeline_mode<synchronous>, transform_indices = @transform_1, window_bounds = array<i64: 8, 128>}, {pipeline_mode = #tpu.pipeline_mode<synchronous>, transform_indices = @transform_2, window_bounds = array<i64: 1, 128>}, {pipeline_mode = #tpu.pipeline_mode<synchronous>, transform_indices = @transform_3, window_bounds = array<i64: 128, 128>}, {pipeline_mode = #tpu.pipeline_mode<synchronous>, transform_indices = @transform_4, window_bounds = array<i64: 1, 128>}, {pipeline_mode = #tpu.pipeline_mode<synchronous>, transform_indices = @transform_5, window_bounds = array<i64: 128, 8>}, {pipeline_mode = #tpu.pipeline_mode<synchronous>, transform_indices = @transform_6, window_bounds = array<i64: 1, 8>}, {transform_indices = @transform_7, window_bounds = array<i64: 8, 8>}]} {
    %c0 = arith.constant 0 : index
    %c0_0 = arith.constant 0 : index
    %0 = vector.load %arg1[%c0, %c0_0] : memref<8x8xf32, #tpu.memory_space<vmem>>, vector<8x8xf32>
    %c0_1 = arith.constant 0 : index
    %c0_2 = arith.constant 0 : index
    %1 = vector.load %arg2[%c0_1, %c0_2] : memref<8x128xf32, #tpu.memory_space<vmem>>, vector<8x128xf32>
    %cst = arith.constant dense<0.000000e+00> : vector<8x128xf32>
    %2 = tpu.matmul %0, %1, %cst {dimension_numbers = #tpu.dot_dimension_numbers<[1], [0], [0], [1], [0, 0, 1, 1], [], []>} : vector<8x8xf32>, vector<8x128xf32>, vector<8x128xf32> -> vector<8x128xf32>
    %c0_3 = arith.constant 0 : index
    %c0_4 = arith.constant 0 : index
    %3 = vector.load %arg3[%c0_3, %c0_4] : memref<1x128xf32, #tpu.memory_space<vmem>>, vector<1x128xf32>
    %4 = vector.broadcast %3 : vector<1x128xf32> to vector<8x128xf32>
    %5 = arith.addf %2, %4 : vector<8x128xf32>
    %cst_5 = arith.constant 0.000000e+00 : f32
    %6 = vector.broadcast %cst_5 : f32 to vector<8x128xf32>
    %7 = arith.maximumf %5, %6 : vector<8x128xf32>
    %c0_6 = arith.constant 0 : index
    %c0_7 = arith.constant 0 : index
    %8 = vector.load %arg4[%c0_6, %c0_7] : memref<128x128xf32, #tpu.memory_space<vmem>>, vector<128x128xf32>
    %cst_8 = arith.constant dense<0.000000e+00> : vector<8x128xf32>
    %9 = tpu.matmul %7, %8, %cst_8 {dimension_numbers = #tpu.dot_dimension_numbers<[1], [0], [0], [1], [0, 0, 1, 1], [], []>} : vector<8x128xf32>, vector<128x128xf32>, vector<8x128xf32> -> vector<8x128xf32>
    %c0_9 = arith.constant 0 : index
    %c0_10 = arith.constant 0 : index
    %10 = vector.load %arg5[%c0_9, %c0_10] : memref<1x128xf32, #tpu.memory_space<vmem>>, vector<1x128xf32>
    %11 = vector.broadcast %10 : vector<1x128xf32> to vector<8x128xf32>
    %12 = arith.addf %9, %11 : vector<8x128xf32>
    %cst_11 = arith.constant 0.000000e+00 : f32
    %13 = vector.broadcast %cst_11 : f32 to vector<8x128xf32>
    %14 = arith.maximumf %12, %13 : vector<8x128xf32>
    %c0_12 = arith.constant 0 : index
    %c0_13 = arith.constant 0 : index
    %15 = vector.load %arg6[%c0_12, %c0_13] : memref<128x8xf32, #tpu.memory_space<vmem>>, vector<128x8xf32>
    %cst_14 = arith.constant dense<0.000000e+00> : vector<8x8xf32>
    %16 = tpu.matmul %14, %15, %cst_14 {dimension_numbers = #tpu.dot_dimension_numbers<[1], [0], [0], [1], [0, 0, 1, 1], [], []>} : vector<8x128xf32>, vector<128x8xf32>, vector<8x8xf32> -> vector<8x8xf32>
    %c0_15 = arith.constant 0 : index
    %c0_16 = arith.constant 0 : index
    %17 = vector.load %arg7[%c0_15, %c0_16] : memref<1x8xf32, #tpu.memory_space<vmem>>, vector<1x8xf32>
    %18 = vector.broadcast %17 : vector<1x8xf32> to vector<8x8xf32>
    %19 = arith.addf %16, %18 : vector<8x8xf32>
    %c0_17 = arith.constant 0 : index
    %c0_18 = arith.constant 0 : index
    %20 = vector.load %arg8[%c0_17, %c0_18] : memref<8x8xf32, #tpu.memory_space<vmem>>, vector<8x8xf32>
    tpu.vector_store %arg8[%c0_17, %c0_18], %19 {strides = array<i32>} : memref<8x8xf32, #tpu.memory_space<vmem>>, vector<8x8xf32>,
    return
  }
  func.func @transform_0(%arg0: i32) -> (i32, i32) {
    %c0_i32 = arith.constant 0 : i32
    %c0_i32_0 = arith.constant 0 : i32
    return %arg0, %c0_i32 : i32, i32
  }
  func.func @transform_1(%arg0: i32) -> (i32, i32) {
    %c0_i32 = arith.constant 0 : i32
    %c0_i32_0 = arith.constant 0 : i32
    %c0_i32_1 = arith.constant 0 : i32
    return %c0_i32, %c0_i32_0 : i32, i32
  }
  func.func @transform_2(%arg0: i32) -> (i32, i32) {
    %c0_i32 = arith.constant 0 : i32
    %c0_i32_0 = arith.constant 0 : i32
    %c0_i32_1 = arith.constant 0 : i32
    return %c0_i32, %c0_i32_0 : i32, i32
  }
  func.func @transform_3(%arg0: i32) -> (i32, i32) {
    %c0_i32 = arith.constant 0 : i32
    %c0_i32_0 = arith.constant 0 : i32
    %c0_i32_1 = arith.constant 0 : i32
    return %c0_i32, %c0_i32_0 : i32, i32
  }
  func.func @transform_4(%arg0: i32) -> (i32, i32) {
    %c0_i32 = arith.constant 0 : i32
    %c0_i32_0 = arith.constant 0 : i32
    %c0_i32_1 = arith.constant 0 : i32
    return %c0_i32, %c0_i32_0 : i32, i32
  }
  func.func @transform_5(%arg0: i32) -> (i32, i32) {
    %c0_i32 = arith.constant 0 : i32
    %c0_i32_0 = arith.constant 0 : i32
    %c0_i32_1 = arith.constant 0 : i32
    return %c0_i32, %c0_i32_0 : i32, i32
  }
  func.func @transform_6(%arg0: i32) -> (i32, i32) {
    %c0_i32 = arith.constant 0 : i32
    %c0_i32_0 = arith.constant 0 : i32
    %c0_i32_1 = arith.constant 0 : i32
    return %c0_i32, %c0_i32_0 : i32, i32
  }
  func.func @transform_7(%arg0: i32) -> (i32, i32) {
    %c0_i32 = arith.constant 0 : i32
    %c0_i32_0 = arith.constant 0 : i32
    return %arg0, %c0_i32 : i32, i32
  }
}

</mosaic_0001>

<bundles_post_ra>
// kernel: tpu_custom_call.1
= control target key start
LH: loop header
LB: loop body
LE: loop exit
PB: predicated region body
PF: predicated region fallthrough
CT: control target
= control target key end

     0   :  { %12 = vsyncpa [#allocation3], 0  ;;  %s387_s0 = inlined_call_operand.vmem [shape: f32[8,8], index: 0, kind: input, shape index: {}]   ;;  %s388_s1 = inlined_call_operand.hbm [shape: f32[8,128], index: 1, kind: input, shape index: {}]   ;;  %s389_s2 = inlined_call_operand.vmem [shape: f32[1,128], index: 2, kind: input, shape index: {}]   ;;  %s390_s3 = inlined_call_operand.vmem [shape: f32[128,128], index: 3, kind: input, shape index: {}]   ;;  %s391_s4 = inlined_call_operand.vmem [shape: f32[1,128], index: 4, kind: input, shape index: {}]   ;;  %s392_s5 = inlined_call_operand.vmem [shape: f32[128,8], index: 5, kind: input, shape index: {}]   ;;  %s393_s6 = inlined_call_operand.vmem [shape: f32[1,8], index: 6, kind: input, shape index: {}]   ;;  %s394_s7 = inlined_call_operand.hbm [shape: f32[8,8], index: 7, kind: output, shape index: {}]  }
   0x1   :  { %13 = vsyncpa [#allocation4], 0  ;;  %s21_s26 = sshll.u32 %s388_s1, 4  ;;  %s229_s27 = smov [#allocation2]   ;;  %s22_s26 = int_to_ptr.hbm [resolvable:$true] %s21_s26 }
   0x2   :  { %s23_s28 = sshll.u32 %s229_s27, 4  ;;  %s24_s28 = int_to_ptr.vmem [resolvable:$true] %s23_s28 }
   0x3   :  { %26 = dma.hbm_to_vmem [thread:$0]  %s22_s26, 128, %s24_s28, [#allocation3]  }
   0x4   :  { %225 = dma.done.wait [#allocation3], 128  }
   0x5   :  { %226 = vsyncadd [#allocation3], 4294967168  ;;  %vm47_vm0 = vcmask 64512   ;;  %v42_v0 = vld [vmem:[#allocation2] sm:$0xff]  ;;  %v87_v2 = vld [vmem:[%s390_s3 + $0x78] sm:$0xff]  ;;  %s230_s23 = smov [#allocation5]  }
   0x6   :  { %v41_v1 = vld [vmem:[%s387_s0] sm:$0xff]  ;;  %66 = vmatpush.msra.mxu0 %v42_v0  ;;  %92 = vmatpush.msra.mxu1 %v87_v2  ;;  %v86_v3 = vld [vmem:[%s390_s3 + $0x70] sm:$0xff]  ;;  %v85_v4 = vld [vmem:[%s390_s3 + $0x68] sm:$0xff]  ;;  %s159_s24 = sshll.u32 %s230_s23, 4  ;;  %s161_s27 = sshll.u32 %s394_s7, 4  ;;  %s160_s24 = int_to_ptr.vmem [resolvable:$true] %s159_s24  ;;  %s162_s27 = int_to_ptr.hbm [resolvable:$true] %s161_s27 }
   0x7   :  { %171 = vmatmul.msk.f32.vlgmr.msra.gmra.mxu0 %vm47_vm0, %v41_v1  ;;  %v84_v5 = vld [vmem:[%s390_s3 + $0x60] sm:$0xff]  ;;  %v83_v6 = vld [vmem:[%s390_s3 + $0x58] sm:$0xff]  ;;  %v82_v7 = vld [vmem:[%s390_s3 + $0x50] sm:$0xff] }
   0x8   :  { %93 = vmatpush.msra.mxu1 %v86_v3  ;;  %v81_v8 = vld [vmem:[%s390_s3 + $0x48] sm:$0xff]  ;;  %v80_v9 = vld [vmem:[%s390_s3 + $0x40] sm:$0xff]  ;;  %v79_v10 = vld [vmem:[%s390_s3 + $0x38] sm:$0xff] }
   0x9   :  { %v78_v11 = vld [vmem:[%s390_s3 + $0x30] sm:$0xff]  ;;  %v77_v12 = vld [vmem:[%s390_s3 + $0x28] sm:$0xff]  ;;  %v76_v13 = vld [vmem:[%s390_s3 + $0x20] sm:$0xff] }
   0xa   :  { %94 = vmatpush.msra.mxu1 %v85_v4  ;;  %v75_v14 = vld [vmem:[%s390_s3 + $0x18] sm:$0xff]  ;;  %v74_v15 = vld [vmem:[%s390_s3 + $0x10] sm:$0xff]  ;;  %v73_v16 = vld [vmem:[%s390_s3 + $0x8] sm:$0xff] }
   0xb   :  { %v72_v17 = vld [vmem:[%s390_s3] sm:$0xff]  ;;  %v128_v18 = vld [vmem:[%s392_s5 + $0x78] sm:$0xff]  ;;  %v127_v19 = vld [vmem:[%s392_s5 + $0x70] sm:$0xff] }
   0xc   :  { %95 = vmatpush.msra.mxu1 %v84_v5  ;;  %133 = vmatpush.msra.mxu2 %v128_v18  ;;  %v126_v20 = vld [vmem:[%s392_s5 + $0x68] sm:$0xff]  ;;  %v125_v21 = vld [vmem:[%s392_s5 + $0x60] sm:$0xff]  ;;  %v124_v22 = vld [vmem:[%s392_s5 + $0x58] sm:$0xff] }
   0xd   :  { %v123_v23 = vld [vmem:[%s392_s5 + $0x50] sm:$0xff]  ;;  %v122_v24 = vld [vmem:[%s392_s5 + $0x48] sm:$0xff]  ;;  %v121_v25 = vld [vmem:[%s392_s5 + $0x40] sm:$0xff] }
   0xe   :  { %96 = vmatpush.msra.mxu1 %v83_v6  ;;  %134 = vmatpush.msra.mxu2 %v127_v19  ;;  %v120_v26 = vld [vmem:[%s392_s5 + $0x38] sm:$0xff]  ;;  %v119_v27 = vld [vmem:[%s392_s5 + $0x30] sm:$0xff]  ;;  %v118_v28 = vld [vmem:[%s392_s5 + $0x28] sm:$0xff] }
   0xf   :  { %v117_v29 = vld [vmem:[%s392_s5 + $0x20] sm:$0xff]  ;;  %v116_v30 = vld [vmem:[%s392_s5 + $0x18] sm:$0xff]  ;;  %v115_v35 = vld [vmem:[%s392_s5 + $0x10] sm:$0xff] }
  0x10   :  { %97 = vmatpush.msra.mxu1 %v82_v7  ;;  %135 = vmatpush.msra.mxu2 %v126_v20  ;;  %v174_v31 = vld [vmem:[%s389_s2] ss:$0 sm:$0xff]  ;;  %v114_v36 = vld [vmem:[%s392_s5 + $0x8] sm:$0xff] }
  0x11   :  { %v113_v37 = vld [vmem:[%s392_s5] sm:$0xff] }
  0x12   :  { %98 = vmatpush.msra.mxu1 %v81_v8  ;;  %136 = vmatpush.msra.mxu2 %v125_v21  ;;  %v175_v38 = vld [vmem:[%s391_s4] ss:$0 sm:$0xff] }
  0x13   :  { %v176_v42 = vld [vmem:[%s393_s6] ss:$0 sm:$0xff] }
  0x14   :  { %99 = vmatpush.msra.mxu1 %v80_v9  ;;  %137 = vmatpush.msra.mxu2 %v124_v22 }
  0x16   :  { %100 = vmatpush.msra.mxu1 %v79_v10  ;;  %138 = vmatpush.msra.mxu2 %v123_v23 }
  0x18   :  { %101 = vmatpush.msra.mxu1 %v78_v11  ;;  %139 = vmatpush.msra.mxu2 %v122_v24 }
  0x1a   :  { %102 = vmatpush.msra.mxu1 %v77_v12  ;;  %140 = vmatpush.msra.mxu2 %v121_v25 }
  0x1c   :  { %103 = vmatpush.msra.mxu1 %v76_v13  ;;  %141 = vmatpush.msra.mxu2 %v120_v26 }
  0x1e   :  { %104 = vmatpush.msra.mxu1 %v75_v14  ;;  %142 = vmatpush.msra.mxu2 %v119_v27 }
  0x20   :  { %105 = vmatpush.msra.mxu1 %v74_v15  ;;  %143 = vmatpush.msra.mxu2 %v118_v28 }
  0x22   :  { %106 = vmatpush.msra.mxu1 %v73_v16  ;;  %144 = vmatpush.msra.mxu2 %v117_v29 }
  0x24   :  { %107 = vmatpush.msra.mxu1 %v72_v17  ;;  %145 = vmatpush.msra.mxu2 %v116_v30 }
  0x26   :  { %146 = vmatpush.msra.mxu2 %v115_v35 }
  0x28   :  { %147 = vmatpush.msra.mxu2 %v114_v36 }
  0x2a   :  { %148 = vmatpush.msra.mxu2 %v113_v37 }
  0x84   :  { %v68_v32 = vpop.f32.mrf.mxu0 }
  0x85   :  { %v69_v33 = vadd.f32 %v174_v31, %v68_v32 }
  0x87   :  { %v71_v34 = vmax.f32 %v69_v33, 0.0 }
  0x89   :  { %108 = vmatmul.f32.vlgmr.msra.gmra.mxu1 %v71_v34 }
 0x106   :  { %v109_v39 = vpop.f32.mrf.mxu1 }
 0x107   :  { %v110_v40 = vadd.f32 %v175_v38, %v109_v39 }
 0x109   :  { %v112_v41 = vmax.f32 %v110_v40, 0.0 }
 0x10b   :  { %149 = vmatmul.f32.vlgmr.msra.gmra.mxu2 %v112_v41 }
 0x18e   :  { %v150_v43 = vpop.f32.mrf.mxu2 }
 0x18f   :  { %v151_v44 = vadd.f32 %v176_v42, %v150_v43 }
 0x191   :  { %153 = vst.msk [vmem:[#allocation5] sm:$0xff] %vm47_vm0, %v151_v44 }
 0x192   :  { %164 = dma.vmem_to_hbm [thread:$0]  %s160_s24, 128, %s162_s27, [#allocation4]  }
 0x193   :  { %227 = dma.done.wait [#allocation4], 128  }
 0x194   :  { %228 = vsyncadd [#allocation4], 4294967168 }
 0x195   :  { %169 = vsyncpa [#allocation3], 1 }
 0x196   :  { %170 = vsyncpa [#allocation4], 1 }

</bundles_post_ra>
